<compile_context>
chip_gen: v7x
topology: tpu7x:2x2x1
jax: 0.10.0
libtpu: 0.0.40
codegen_flags: <defaults>
</compile_context>

<pallas_src>
import functools
import math

import numpy as np
import jax
import jax.numpy as jnp
from jax import lax
from jax.experimental import pallas as pl
from jax.experimental.pallas import tpu as pltpu


# ------------------------------ tiling helper ------------------------------ #

def _pick_tile(n, max_tile):
    """Largest divisor of n that is <= max_tile and a multiple of 8 (or n itself)."""
    for t in range(min(n, max_tile), 0, -1):
        if n % t == 0 and (t % 8 == 0 or t == n):
            return t
    return n


# ----------------------------- Pallas kernels ------------------------------ #

def _qkv_proj_kernel(x_ref, w_ref, q_ref, k_ref, v_ref):
    # x: (TM, E) bf16 row tile;  w: (E, 3E) bf16 fused [Wq*scale | Wk | Wv], resident.
    x = x_ref[...]
    y = jnp.dot(x, w_ref[...], preferred_element_type=jnp.float32)    # (TM, 3E) f32
    e = q_ref.shape[-1]
    q_ref[...] = y[:, :e].astype(q_ref.dtype)
    k_ref[...] = y[:, e:2 * e].astype(k_ref.dtype)
    v_ref[...] = y[:, 2 * e:].astype(v_ref.dtype)


def _out_proj_kernel(x_ref, w_ref, o_ref):
    # x: (TM, E) bf16;  w: (E, E) bf16, ALREADY transposed on host (y = x @ W^T).
    o_ref[...] = jnp.dot(x_ref[...], w_ref[...],
                         preferred_element_type=jnp.float32).astype(o_ref.dtype)


def _attn_kernel(num_heads, head_dim, mask_future, use_kpm, need_weights, *refs):
    # One program = one batch element x one q tile, ALL heads.
    if use_kpm:
        q_ref, k_ref, v_ref, kpm_ref = refs[:4]
        out_refs = refs[4:]
    else:
        q_ref, k_ref, v_ref = refs[:3]
        kpm_ref = None
        out_refs = refs[3:]
    if need_weights:
        o_ref, w_ref = out_refs
    else:
        (o_ref,) = out_refs
        w_ref = None

    q = q_ref[0]                       # (TQ, E) bf16  (scaling folded into Wq)
    k = k_ref[0]                       # (S,  E) bf16
    v = v_ref[0]                       # (S,  E) bf16
    tq = q.shape[0]
    s_len = k.shape[0]
    neg_inf = jnp.float32(-jnp.inf)

    # Build the combined mask once per program (shared across heads).
    masked = None
    if mask_future:
        row = tq * pl.program_id(1) + lax.broadcasted_iota(jnp.int32, (tq, s_len), 0)
        col = lax.broadcasted_iota(jnp.int32, (tq, s_len), 1)
        masked = col > row
    if use_kpm:
        kpm = jnp.broadcast_to(kpm_ref[0] > 0.0, (tq, s_len))   # (TQ, S) bool
        masked = kpm if masked is None else jnp.logical_or(masked, kpm)

    ctx_parts = []
    w_acc = jnp.zeros((tq, s_len), jnp.float32) if need_weights else None
    for h in range(num_heads):
        lo = h * head_dim
        qh = q[:, lo:lo + head_dim]                              # (TQ, Dh)
        kh = k[:, lo:lo + head_dim]                              # (S,  Dh)
        vh = v[:, lo:lo + head_dim]                              # (S,  Dh)
        # q @ k^T without materializing a transpose (contract last dims).
        s = lax.dot_general(qh, kh, (((1,), (1,)), ((), ())),
                            preferred_element_type=jnp.float32)  # (TQ, S)
        if masked is not None:
            s = jnp.where(masked, neg_inf, s)
        m = jnp.max(s, axis=-1, keepdims=True)
        p = jnp.exp(s - m)
        l = jnp.sum(p, axis=-1, keepdims=True)
        inv = pl.reciprocal(l, approx=True)                      # EUP slot (cheap)
        if need_weights:
            pn = p * inv
            w_acc = w_acc + pn
            ctx = jnp.dot(pn.astype(v.dtype), vh,
                          preferred_element_type=jnp.float32)    # (TQ, Dh)
        else:
            # Defer normalization: (TQ,Dh) multiply instead of (TQ,S).
            ctx = jnp.dot(p.astype(v.dtype), vh,
                          preferred_element_type=jnp.float32) * inv
        ctx_parts.append(ctx)

    ctx_all = ctx_parts[0] if num_heads == 1 else jnp.concatenate(ctx_parts, axis=-1)
    o_ref[0] = ctx_all.astype(o_ref.dtype)                       # lane-dense store (E wide)
    if need_weights:
        w_ref[0] = (w_acc * (1.0 / num_heads)).astype(w_ref.dtype)
    # TODO(synk): F.dropout on attention weights (training mode) not implemented; eval assumed.


# ------------------------------ Python wrapper ------------------------------ #

class MultiheadAttentionPallas:
    """Pallas TPU implementation of fairseq MultiheadAttention forward (self-attn path)."""

    def __init__(self, embed_dim, num_heads, dropout=0.0, bias=False, key=None,
                 vmem_limit_bytes=None):
        assert embed_dim % num_heads == 0
        assert not bias, "module is constructed with bias=False"
        self.embed_dim = embed_dim
        self.num_heads = num_heads
        self.head_dim = embed_dim // num_heads
        self.dropout = dropout
        self.scaling = self.head_dim ** (-0.5)
        # Raise toward physical VMEM (128 MiB v5e/v6e, 64 MiB v7x) for large shapes.
        self.vmem_limit_bytes = vmem_limit_bytes

        # Deterministic xavier_uniform init (bound = sqrt(6/(fan_in+fan_out))).
        bound = math.sqrt(6.0 / (embed_dim + embed_dim))
        k1, k2, k3, k4 = jax.random.split(key, 4)
        init = lambda k: jax.random.uniform(k, (embed_dim, embed_dim),
                                            jnp.float32, -bound, bound)
        self.wq = init(k1)      # used as x @ Wq   (matches torch.addmm path)
        self.wk = init(k2)
        self.wv = init(k3)
        self.w_out = init(k4)   # nn.Linear weight (out, in): used as x @ W^T

        # Kernel-side weights: fused QKV with scaling folded into Wq; bf16 (AMP-style,
        # matching the module's amp.custom_fwd(cast_inputs=half) path).
        self.w_qkv_bf = jnp.concatenate(
            [self.wq * self.scaling, self.wk, self.wv], axis=1).astype(jnp.bfloat16)
        self.w_out_t_bf = jnp.transpose(self.w_out).astype(jnp.bfloat16)  # one-time host transpose

    # --------------------------------------------------------------------- #

    def _row_proj(self, kernel, x2d, w, out_dtype):
        nr, e = x2d.shape
        tm = _pick_tile(nr, 512)
        cp = pltpu.CompilerParams(dimension_semantics=("parallel",),
                                  vmem_limit_bytes=self.vmem_limit_bytes)
        if kernel is _qkv_proj_kernel:
            out_shape = (jax.ShapeDtypeStruct((nr, e), out_dtype),) * 3
            out_specs = (pl.BlockSpec((tm, e), lambda i: (i, 0)),) * 3
        else:
            out_shape = jax.ShapeDtypeStruct((nr, e), out_dtype)
            out_specs = pl.BlockSpec((tm, e), lambda i: (i, 0))
        return pl.pallas_call(
            kernel,
            out_shape=out_shape,
            grid=(nr // tm,),
            in_specs=[pl.BlockSpec((tm, e), lambda i: (i, 0)),
                      pl.BlockSpec(w.shape, lambda i: (0, 0))],   # weight resident
            out_specs=out_specs,
            compiler_params=cp,
        )(x2d, w)

    def __call__(self, query, key, value, mask_future_timesteps=False,
                 key_padding_mask=None, incremental_state=None,
                 need_weights=True, static_kv=False):
        # TODO(synk): kv_same / encoder-decoder projection path and incremental_state
        # (decoding cache) are not implemented; self-attention only.
        assert incremental_state is None
        T, B, E = query.shape
        H, Dh = self.num_heads, self.head_dim
        S = T  # self-attention

        # (T,B,E) -> (B,T,E): the ONLY input-side layout transpose; cast to bf16.
        xb = jnp.transpose(query, (1, 0, 2)).astype(jnp.bfloat16)
        x2d = xb.reshape(B * T, E)

        # -- fused QKV projection (Pallas, row-tiled, bf16, weight resident) --
        q2d, k2d, v2d = self._row_proj(_qkv_proj_kernel, x2d, self.w_qkv_bf, jnp.bfloat16)
        qb = q2d.reshape(B, T, E)     # free reshapes, no transposes
        kb = k2d.reshape(B, T, E)
        vb = v2d.reshape(B, T, E)

        # -- attention core (Pallas, grid over (batch, q tiles), all heads/program) --
        use_kpm = key_padding_mask is not None
        TQ = _pick_tile(T, 256)
        kern = functools.partial(_attn_kernel, H, Dh,
                                 bool(mask_future_timesteps), use_kpm, bool(need_weights))
        in_specs = [pl.BlockSpec((1, TQ, E), lambda b, qi: (b, qi, 0)),
                    pl.BlockSpec((1, S, E), lambda b, qi: (b, 0, 0)),
                    pl.BlockSpec((1, S, E), lambda b, qi: (b, 0, 0))]
        args = [qb, kb, vb]
        if use_kpm:
            kpm = key_padding_mask.astype(jnp.float32).reshape(B, 1, S)
            in_specs.append(pl.BlockSpec((1, 1, S), lambda b, qi: (b, 0, 0)))
            args.append(kpm)
        out_shapes = [jax.ShapeDtypeStruct((B, T, E), jnp.bfloat16)]
        out_specs = [pl.BlockSpec((1, TQ, E), lambda b, qi: (b, qi, 0))]
        if need_weights:
            out_shapes.append(jax.ShapeDtypeStruct((B, T, S), jnp.float32))
            out_specs.append(pl.BlockSpec((1, TQ, S), lambda b, qi: (b, qi, 0)))
        # TODO(synk): for very long S, add a kv-tile grid axis with online softmax
        # (flash-style) and causal tile skipping; current version keeps full S resident.
        outs = pl.pallas_call(
            kern,
            out_shape=tuple(out_shapes),
            grid=(B, T // TQ),
            in_specs=in_specs,
            out_specs=tuple(out_specs),
            compiler_params=pltpu.CompilerParams(
                dimension_semantics=("parallel", "parallel"),
                vmem_limit_bytes=self.vmem_limit_bytes),
        )(*args)
        if need_weights:
            ctx, attn_weights = outs
        else:
            (ctx,) = outs
            attn_weights = jnp.zeros((0,), jnp.float32)

        # -- output projection (Pallas, row-tiled, pre-transposed bf16 weight) --
        out2d = self._row_proj(_out_proj_kernel, ctx.reshape(B * T, E),
                               self.w_out_t_bf, jnp.float32)
        attn = jnp.transpose(out2d.reshape(B, T, E), (1, 0, 2))   # back to (T,B,E)
        return attn, attn_weights

    # Pure-JAX reference of the same forward (mirrors the kernel's bf16 rounding).
    def reference(self, query, key_padding_mask, mask_future_timesteps):
        T, B, E = query.shape
        H, Dh = self.num_heads, self.head_dim
        f32 = jnp.float32
        xb = jnp.transpose(query, (1, 0, 2)).astype(jnp.bfloat16).astype(f32)   # (B,T,E)
        qkv = jnp.einsum("bte,ef->btf", xb, self.w_qkv_bf.astype(f32))
        q = qkv[..., :E].astype(jnp.bfloat16).astype(f32)
        k = qkv[..., E:2 * E].astype(jnp.bfloat16).astype(f32)
        v = qkv[..., 2 * E:].astype(jnp.bfloat16).astype(f32)
        qh = q.reshape(B, T, H, Dh)
        kh = k.reshape(B, T, H, Dh)
        vh = v.reshape(B, T, H, Dh)
        s = jnp.einsum("bthd,bshd->bhts", qh, kh)
        if mask_future_timesteps:
            tri = jnp.triu(jnp.full((T, T), -jnp.inf, f32), 1)
            s = s + tri[None, None]
        if key_padding_mask is not None:
            s = jnp.where(key_padding_mask[:, None, None, :], -jnp.inf, s)
        p = jax.nn.softmax(s, axis=-1)
        ctx = jnp.einsum("bhts,bshd->bthd", p.astype(jnp.bfloat16).astype(f32), vh)
        ctx = ctx.reshape(B, T, E).astype(jnp.bfloat16).astype(f32)
        out = jnp.einsum("bte,ef->btf", ctx, self.w_out_t_bf.astype(f32))
        attn = jnp.transpose(out, (1, 0, 2))
        w = p.mean(axis=1)   # (B, T, S) head-averaged weights
        return attn, w


# ---------------------------------- main ----------------------------------- #

if __name__ == "__main__":
    T, B, E, H = 8, 2, 32, 4
    root = jax.random.PRNGKey(0)
    k_params, k_x = jax.random.split(root)

    mha = MultiheadAttentionPallas(E, H, dropout=0.0, bias=False, key=k_params)
    query = jax.random.normal(k_x, (T, B, E), jnp.float32)
    # pad the last key position of batch 1
    key_padding_mask = jnp.zeros((B, T), dtype=bool).at[1, T - 1].set(True)

    attn, attn_weights = mha(query, query, query,
                             mask_future_timesteps=True,
                             key_padding_mask=key_padding_mask,
                             incremental_state=None,
                             need_weights=True,
                             static_kv=False)
    attn = jax.block_until_ready(attn)
    attn_weights = jax.block_until_ready(attn_weights)

    ref_attn, ref_w = mha.reference(query, key_padding_mask, True)
    # bf16 matmuls + approx reciprocal -> loosened tolerance vs f32 reference math.
    np.testing.assert_allclose(np.asarray(attn), np.asarray(ref_attn), rtol=2e-2, atol=2e-2)
    np.testing.assert_allclose(np.asarray(attn_weights), np.asarray(ref_w), rtol=2e-2, atol=2e-2)

    print("KERNEL_OK")
</pallas_src>

<mosaic_0001>
module attributes {stable_mosaic.version = 11 : i64} {
  func.func @_qkv_proj_kernel(%arg0: i32, %arg1: memref<16x32xbf16, #tpu.memory_space<vmem>>, %arg2: memref<32x96xbf16, #tpu.memory_space<vmem>>, %arg3: memref<16x32xbf16, #tpu.memory_space<vmem>>, %arg4: memref<16x32xbf16, #tpu.memory_space<vmem>>, %arg5: memref<16x32xbf16, #tpu.memory_space<vmem>>) attributes {dimension_semantics = [#tpu.dimension_semantics<parallel>], iteration_bounds = array<i64: 1>, scalar_prefetch = 0 : i64, scratch_operands = 0 : i64, tpu.core_type = #tpu.core_type<tc>, window_params = [{transform_indices = @transform_0, window_bounds = array<i64: 16, 32>}, {pipeline_mode = #tpu.pipeline_mode<synchronous>, transform_indices = @transform_1, window_bounds = array<i64: 32, 96>}, {transform_indices = @transform_2, window_bounds = array<i64: 16, 32>}, {transform_indices = @transform_3, window_bounds = array<i64: 16, 32>}, {transform_indices = @transform_4, window_bounds = array<i64: 16, 32>}]} {
    %c0 = arith.constant 0 : index
    %c0_0 = arith.constant 0 : index
    %0 = vector.load %arg1[%c0, %c0_0] : memref<16x32xbf16, #tpu.memory_space<vmem>>, vector<16x32xbf16>
    %c0_1 = arith.constant 0 : index
    %c0_2 = arith.constant 0 : index
    %1 = vector.load %arg2[%c0_1, %c0_2] : memref<32x96xbf16, #tpu.memory_space<vmem>>, vector<32x96xbf16>
    %cst = arith.constant dense<0.000000e+00> : vector<16x96xf32>
    %2 = tpu.matmul %0, %1, %cst {dimension_numbers = #tpu.dot_dimension_numbers<[1], [0], [0], [1], [0, 0, 1, 1], [], []>} : vector<16x32xbf16>, vector<32x96xbf16>, vector<16x96xf32> -> vector<16x96xf32>
    %3 = vector.extract_strided_slice %2 {offsets = [0, 0], sizes = [16, 32], strides = [1, 1]} : vector<16x96xf32> to vector<16x32xf32>
    %4 = arith.truncf %3 : vector<16x32xf32> to vector<16x32xbf16>
    %c0_3 = arith.constant 0 : index
    %c0_4 = arith.constant 0 : index
    %5 = vector.load %arg3[%c0_3, %c0_4] : memref<16x32xbf16, #tpu.memory_space<vmem>>, vector<16x32xbf16>
    tpu.vector_store %arg3[%c0_3, %c0_4], %4 {strides = array<i32>} : memref<16x32xbf16, #tpu.memory_space<vmem>>, vector<16x32xbf16>,
    %6 = vector.extract_strided_slice %2 {offsets = [0, 32], sizes = [16, 32], strides = [1, 1]} : vector<16x96xf32> to vector<16x32xf32>
    %7 = arith.truncf %6 : vector<16x32xf32> to vector<16x32xbf16>
    %c0_5 = arith.constant 0 : index
    %c0_6 = arith.constant 0 : index
    %8 = vector.load %arg4[%c0_5, %c0_6] : memref<16x32xbf16, #tpu.memory_space<vmem>>, vector<16x32xbf16>
    tpu.vector_store %arg4[%c0_5, %c0_6], %7 {strides = array<i32>} : memref<16x32xbf16, #tpu.memory_space<vmem>>, vector<16x32xbf16>,
    %9 = vector.extract_strided_slice %2 {offsets = [0, 64], sizes = [16, 32], strides = [1, 1]} : vector<16x96xf32> to vector<16x32xf32>
    %10 = arith.truncf %9 : vector<16x32xf32> to vector<16x32xbf16>
    %c0_7 = arith.constant 0 : index
    %c0_8 = arith.constant 0 : index
    %11 = vector.load %arg5[%c0_7, %c0_8] : memref<16x32xbf16, #tpu.memory_space<vmem>>, vector<16x32xbf16>
    tpu.vector_store %arg5[%c0_7, %c0_8], %10 {strides = array<i32>} : memref<16x32xbf16, #tpu.memory_space<vmem>>, vector<16x32xbf16>,
    return
  }
  func.func @transform_0(%arg0: i32) -> (i32, i32) {
    %c0_i32 = arith.constant 0 : i32
    %c0_i32_0 = arith.constant 0 : i32
    return %arg0, %c0_i32 : i32, i32
  }
  func.func @transform_1(%arg0: i32) -> (i32, i32) {
    %c0_i32 = arith.constant 0 : i32
    %c0_i32_0 = arith.constant 0 : i32
    %c0_i32_1 = arith.constant 0 : i32
    return %c0_i32, %c0_i32_0 : i32, i32
  }
  func.func @transform_2(%arg0: i32) -> (i32, i32) {
    %c0_i32 = arith.constant 0 : i32
    %c0_i32_0 = arith.constant 0 : i32
    return %arg0, %c0_i32 : i32, i32
  }
  func.func @transform_3(%arg0: i32) -> (i32, i32) {
    %c0_i32 = arith.constant 0 : i32
    %c0_i32_0 = arith.constant 0 : i32
    return %arg0, %c0_i32 : i32, i32
  }
  func.func @transform_4(%arg0: i32) -> (i32, i32) {
    %c0_i32 = arith.constant 0 : i32
    %c0_i32_0 = arith.constant 0 : i32
    return %arg0, %c0_i32 : i32, i32
  }
}

</mosaic_0001>

<bundles_post_ra>
// kernel: tpu_custom_call.1
= control target key start
LH: loop header
LB: loop body
LE: loop exit
PB: predicated region body
PF: predicated region fallthrough
CT: control target
= control target key end

     0   :  { %10 = vsyncpa [#allocation3], 0  ;;  %s464_s0 = inlined_call_operand.hbm [shape: bf16[16,32], index: 0, kind: input, shape index: {}]   ;;  %s465_s1 = inlined_call_operand.hbm [shape: bf16[32,96], index: 1, kind: input, shape index: {}]   ;;  %s466_s2 = inlined_call_operand.hbm [shape: bf16[16,32], index: 2, kind: output, shape index: {0}]   ;;  %s467_s3 = inlined_call_operand.hbm [shape: bf16[16,32], index: 3, kind: output, shape index: {1}]   ;;  %s468_s4 = inlined_call_operand.hbm [shape: bf16[16,32], index: 4, kind: output, shape index: {2}]  }
   0x1   :  { %11 = vsyncpa [#allocation6], 0 }
   0x2   :  { %12 = vsyncpa [#allocation4], 0 }
   0x3   :  { %13 = vsyncpa [#allocation9], 0  ;;  %s339_s15 = smov [#allocation2]   ;;  %s221_s19 = scalar_lea.hbm %s464_s0, 128 }
   0x4   :  { %s19_s16 = sshll.u32 %s339_s15, 4  ;;  %p222_p0 = scmp.ne.s32.totalorder %s464_s0, %s221_s19  ;;  %s20_s16 = int_to_ptr.vmem [resolvable:$true] %s19_s16 }
   0x5   :  { %p225_p1 = scmp.lt.u32.totalorder %s221_s19, %s464_s0 }
   0x7   :  { %p227_p2 = pnand %p225_p1, %p222_p0 }
   0x9   :  { %230 = shalt.err (!%p227_p2)
}
   0xa   :  { %s231_s24 = scalar_lea.vmem %s20_s16, 128  ;;  %p236_p4 = scmp.lt.s32.totalorder %s20_s16, %s20_s16 }
   0xb   :  { %p232_p3 = scmp.ne.s32.totalorder %s20_s16, %s231_s24  ;;  %p237_p5 = scmp.lt.s32.totalorder %s231_s24, %s231_s24 }
   0xd   :  { %p238_p6 = por %p237_p5, %p236_p4 }
   0xf   :  { %p239_p7 = pnand %p238_p6, %p232_p3 }
  0x11   :  { %242 = shalt.err (!%p239_p7)
}
  0x12   :  { %s340_s25 = smov 64   ;;  %s341_s26 = smov 4  }
  0x13   :  { %25 = dma.hbm_to_vmem [thread:$0]  %s464_s0, 128, %s20_s16, [#allocation3], %s340_s25, %s340_s25, %s341_s26  }
  0x14   :  { %s342_s29 = smov [#allocation5]   ;;  %s243_s7 = scalar_lea.hbm %s465_s1, 256 }
  0x15   :  { %s31_s30 = sshll.u32 %s342_s29, 4  ;;  %p244_p8 = scmp.ne.s32.totalorder %s465_s1, %s243_s7  ;;  %s32_s30 = int_to_ptr.vmem [resolvable:$true] %s31_s30 }
  0x16   :  { %p247_p9 = scmp.lt.u32.totalorder %s243_s7, %s465_s1 }
  0x18   :  { %p249_p10 = pnand %p247_p9, %p244_p8 }
  0x1a   :  { %252 = shalt.err (!%p249_p10)
}
  0x1b   :  { %s253_s12 = scalar_lea.vmem %s32_s30, 256  ;;  %p258_p12 = scmp.lt.s32.totalorder %s32_s30, %s32_s30 }
  0x1c   :  { %p254_p11 = scmp.ne.s32.totalorder %s32_s30, %s253_s12  ;;  %p259_p13 = scmp.lt.s32.totalorder %s253_s12, %s253_s12 }
  0x1e   :  { %p260_p0 = por %p259_p13, %p258_p12 }
  0x20   :  { %p261_p1 = pnand %p260_p0, %p254_p11 }
  0x22   :  { %264 = shalt.err (!%p261_p1)
}
  0x23   :  { %37 = dma.hbm_to_vmem [thread:$0]  %s465_s1, 256, %s32_s30, [#allocation6], %s340_s25, %s340_s25, %s341_s26  }
  0x24   :  { %331 = dma.done.wait [#allocation3], 128  }
  0x25   :  { %332 = vsyncadd [#allocation3], 4294967168 }
  0x26   :  { %333 = dma.done.wait [#allocation6], 256  }
  0x27   :  { %334 = vsyncadd [#allocation6], 4294967040  ;;  %v343_v0 = vmov 0.0   ;;  %vm344_vm0 = vmmov 0   ;;  %v218_v1 = vld [vmem:[#allocation5] sm:$0xff]   ;;  %v219_v2 = vld [vmem:[#allocation5 + $0x8] sm:$0xff]  }
  0x28   :  { %200 = vmatprep.subr.bf16.mxu0 %v343_v0  ;;  %204 = vmatprep.mubr.msk.bf16.mxu0 %vm344_vm0, %v343_v0  ;;  %v220_v3 = vld [vmem:[#allocation2] sm:$0xff]   ;;  %vm68_vm1 = vcmask 261120   ;;  %vm121_vm2 = vcmask 257024   ;;  %s345_s14 = smov [#allocation7]   ;;  %s346_s15 = smov 96  }
  0x29   :  { %201 = vmatpush3.bf16.msra.mxu0 %v218_v1  ;;  %s145_s1 = sshll.u32 %s345_s14, 4  ;;  %s146_s1 = int_to_ptr.vmem [resolvable:$true] %s145_s1 }
  0x2a   :  { %202 = vmatprep.subr.bf16.mxu0 %v343_v0  ;;  %s265_s16 = scalar_lea.vmem %s146_s1, 128  ;;  %p270_p3 = scmp.lt.s32.totalorder %s146_s1, %s146_s1 }
  0x2b   :  { %p266_p2 = scmp.ne.s32.totalorder %s146_s1, %s265_s16  ;;  %p271_p4 = scmp.lt.s32.totalorder %s265_s16, %s265_s16 }
  0x2d   :  { %203 = vmatpush3.bf16.msra.mxu0 %v219_v2  ;;  %p272_p5 = por %p271_p4, %p270_p3 }
  0x2f   :  { %p273_p6 = pnand %p272_p5, %p266_p2 }
  0x30   :  { %205 = vmatmul.mubr.msk.bf16.vlgmr.msra.gmra.mrb[0].mxu0 %vm68_vm1, %v220_v3 }
 0x103   :  { %v106_v4 = vpop.f32.mrb[0].mxu0 }
 0x104   :  { %v195_v5 = vpack.c.bf16 %v106_v4, %v106_v4  ;;  %v206_v6 = vpop.f32.mrb[1].mxu0 }
 0x105   :  { %v109_v7 = vpop.f32.mrb[2].mxu0 }
 0x106   :  { %v196_v8 = vpack.c.bf16 %v109_v7, %v109_v7  ;;  %132 = vrot.lane.b32.xlu1 %v195_v5, %s340_s25  ;;  %124 = vrot.lane.b32.xlu0 %v195_v5, %s346_s15  ;;  %v207_v9 = vpop.f32.mrb[3].mxu0  ;;  %122 = vst.msk [vmem:[#allocation7] sm:$0xf] %vm121_vm2, %v195_v5 }
 0x108   :  { %123 = vst.msk [vmem:[#allocation7 + $0x4] sm:$0xf] %vm121_vm2, %v196_v8 }
 0x109   :  { %276 = shalt.err (!%p273_p6)
}
 0x10a   :  { %s277_s19 = scalar_lea.hbm %s466_s2, 128 }
 0x10b   :  { %p278_p7 = scmp.ne.s32.totalorder %s466_s2, %s277_s19  ;;  %p281_p8 = scmp.lt.u32.totalorder %s277_s19, %s466_s2 }
 0x10d   :  { %p283_p9 = pnand %p281_p8, %p278_p7 }
 0x10f   :  { %286 = shalt.err (!%p283_p9)
}
 0x110   :  { %151 = dma.vmem_to_hbm [thread:$0]  %s146_s1, 128, %s466_s2, [#allocation4], %s340_s25, %s340_s25, %s341_s26  }
 0x111   :  { %134 = vrot.lane.b32.xlu1 %v196_v8, %s340_s25  ;;  %126 = vrot.lane.b32.xlu0 %v196_v8, %s346_s15  ;;  %s347_s28 = smov [#allocation8]   ;;  %s348_s30 = smov [#allocation10]  }
 0x112   :  { %s157_s29 = sshll.u32 %s347_s28, 4  ;;  %s169_s5 = sshll.u32 %s348_s30, 4  ;;  %s158_s29 = int_to_ptr.vmem [resolvable:$true] %s157_s29  ;;  %s425_s5 = int_to_ptr.vmem [resolvable:$true] %s169_s5 }
 0x113   :  { %s287_s2 = scalar_lea.vmem %s158_s29, 128  ;;  %p292_p11 = scmp.lt.s32.totalorder %s158_s29, %s158_s29 }
 0x114   :  { %p288_p10 = scmp.ne.s32.totalorder %s158_s29, %s287_s2  ;;  %p293_p12 = scmp.lt.s32.totalorder %s287_s2, %s287_s2 }
 0x116   :  { %p294_p13 = por %p293_p12, %p292_p11 }
 0x118   :  { %p295_p0 = pnand %p294_p13, %p288_p10 }
 0x178   :  { %v133_v10 = vpop.permute.xlu1 %132  ;;  %v125_v11 = vpop.permute.xlu0 %124 }
 0x179   :  { %138 = vst.msk [vmem:[#allocation10] sm:$0xf] %vm121_vm2, %v133_v10  ;;  %130 = vst.msk [vmem:[#allocation8] sm:$0xf] %vm121_vm2, %v125_v11 }
 0x183   :  { %v135_v12 = vpop.permute.xlu1 %134  ;;  %v127_v13 = vpop.permute.xlu0 %126 }
 0x184   :  { %139 = vst.msk [vmem:[#allocation10 + $0x4] sm:$0xf] %vm121_vm2, %v135_v12  ;;  %131 = vst.msk [vmem:[#allocation8 + $0x4] sm:$0xf] %vm121_vm2, %v127_v13 }
 0x185   :  { %298 = shalt.err (!%p295_p0)
}
 0x186   :  { %s299_s8 = scalar_lea.hbm %s467_s3, 128 }
 0x187   :  { %p300_p1 = scmp.ne.s32.totalorder %s467_s3, %s299_s8  ;;  %p303_p2 = scmp.lt.u32.totalorder %s299_s8, %s467_s3 }
 0x189   :  { %p305_p3 = pnand %p303_p2, %p300_p1 }
 0x18b   :  { %308 = shalt.err (!%p305_p3)
}
 0x18c   :  { %163 = dma.vmem_to_hbm [thread:$0]  %s158_s29, 128, %s467_s3, [#allocation9], %s340_s25, %s340_s25, %s341_s26  }
 0x18d   :  { %s309_s14 = scalar_lea.vmem %s425_s5, 128  ;;  %p314_p5 = scmp.lt.s32.totalorder %s425_s5, %s425_s5 }
 0x18e   :  { %p310_p4 = scmp.ne.s32.totalorder %s425_s5, %s309_s14  ;;  %p315_p6 = scmp.lt.s32.totalorder %s309_s14, %s309_s14 }
 0x190   :  { %p316_p7 = por %p315_p6, %p314_p5 }
 0x192   :  { %p317_p8 = pnand %p316_p7, %p310_p4 }
 0x194   :  { %320 = shalt.err (!%p317_p8)
}
 0x195   :  { %s321_s16 = scalar_lea.hbm %s468_s4, 128 }
 0x196   :  { %p322_p9 = scmp.ne.s32.totalorder %s468_s4, %s321_s16  ;;  %p325_p10 = scmp.lt.u32.totalorder %s321_s16, %s468_s4 }
 0x198   :  { %p327_p11 = pnand %p325_p10, %p322_p9 }
 0x19a   :  { %330 = shalt.err (!%p327_p11)
}
 0x19b   :  { %175 = dma.vmem_to_hbm [thread:$0]  %s425_s5, 128, %s468_s4, [#allocation9], %s340_s25, %s340_s25, %s341_s26  }
 0x19c   :  { %335 = dma.done.wait [#allocation4], 128  }
 0x19d   :  { %336 = vsyncadd [#allocation4], 4294967168 }
 0x19e   :  { %337 = dma.done.wait [#allocation9], 256  }
 0x19f   :  { %338 = vsyncadd [#allocation9], 4294967040 }
 0x1a0   :  { %185 = vsyncpa [#allocation3], 1 }
 0x1a1   :  { %186 = vsyncpa [#allocation6], 1 }
 0x1a2   :  { %187 = vsyncpa [#allocation4], 1 }
 0x1a3   :  { %188 = vsyncpa [#allocation9], 1 }

</bundles_post_ra>
